<compile_context>
chip_gen: v5e
topology: v5e:2x2
jax: 0.10.0
libtpu: 0.0.40
codegen_flags: <defaults>
</compile_context>

<pallas_src>
import jax
import jax.numpy as jnp
from jax.experimental import pallas as pl
from jax.experimental.pallas import tpu as pltpu

X_IN = 28 * 28          # 784
CONV_OUT = X_IN - 2     # 782 (valid conv, kernel=3)
X_PAD = 896             # 7 * 128, lane-aligned conv width
OUT_PAD = 128           # lane-dense logits width (real logits = first 10)


def net_kernel(x_ref, cw_ref, cb_ref,
               w1_ref, b1_ref, w2_ref, b2_ref, w3_ref, b3_ref,
               out_ref):
    # x tile: (TB, 896) bf16 -> f32 for the elementwise conv path.
    x = x_ref[...].astype(jnp.float32)
    k0 = cw_ref[0]
    k1 = cw_ref[1]
    k2 = cw_ref[2]
    kb = cb_ref[0]

    # Conv1d(1,1,3) valid + ReLU, computed full-width with XLU lane rotations:
    #   x1[:, i] = x[:, (i+1) % 896],  x2[:, i] = x[:, (i+2) % 896]
    # Columns >= 782 of y are wrap/pad junk; they are masked by the zero rows of
    # the folded fc1 weight below.
    x1 = pltpu.roll(x, shift=X_PAD - 1, axis=1)
    x2 = pltpu.roll(x, shift=X_PAD - 2, axis=1)
    y = jnp.maximum(x * k0 + x1 * k1 + x2 * k2 + kb, 0.0)          # (TB, 896) f32

    # fc1 with AvgPool1d(2,2) folded into its (896,128) weight; bf16 MXU, f32 accum.
    h1 = jnp.maximum(
        jnp.dot(y.astype(jnp.bfloat16), w1_ref[...],
                preferred_element_type=jnp.float32) + b1_ref[...], 0.0)
    h2 = jnp.maximum(
        jnp.dot(h1.astype(jnp.bfloat16), w2_ref[...],
                preferred_element_type=jnp.float32) + b2_ref[...], 0.0)
    out_ref[...] = (
        jnp.dot(h2.astype(jnp.bfloat16), w3_ref[...],
                preferred_element_type=jnp.float32) + b3_ref[...])


def _round_up(a, m):
    return (a + m - 1) // m * m


def net_forward(x, packed, *, block_b=256):
    """x: (B, 784) float32; packed: output of pack_params. Returns (B, 10) float32."""
    B = x.shape[0]
    tb = min(block_b, _round_up(B, 8))          # batch tile (multiple of 8)
    b_pad = _round_up(B, tb)
    xp = jnp.pad(x, ((0, b_pad - B), (0, X_PAD - X_IN))).astype(jnp.bfloat16)

    cw, cb, w1, b1, w2, b2, w3, b3 = packed

    def wspec(shape):
        # Whole weight as one block, constant index map -> stays VMEM-resident.
        return pl.BlockSpec(shape, lambda i: (0, 0))

    smem = pl.BlockSpec(memory_space=pltpu.MemorySpace.SMEM)

    out = pl.pallas_call(
        net_kernel,
        grid=(b_pad // tb,),
        in_specs=[
            pl.BlockSpec((tb, X_PAD), lambda i: (i, 0)),   # x, pipelined over batch
            smem, smem,                                    # conv taps / bias (scalars)
            wspec(w1.shape), wspec(b1.shape),
            wspec(w2.shape), wspec(b2.shape),
            wspec(w3.shape), wspec(b3.shape),
        ],
        out_specs=pl.BlockSpec((tb, OUT_PAD), lambda i: (i, 0)),
        out_shape=jax.ShapeDtypeStruct((b_pad, OUT_PAD), jnp.float32),
        compiler_params=pltpu.CompilerParams(
            dimension_semantics=("parallel",),             # megacore on v7x
            vmem_limit_bytes=32 * 1024 * 1024,             # safe on v5e/v6e/v7x
        ),
    )(xp, cw, cb, w1, b1, w2, b2, w3, b3)
    return out[:B, :10]


def init_params(key):
    """Deterministic PyTorch-default-style uniform init, PyTorch layouts."""
    ks = jax.random.split(key, 8)

    def u(k, shape, fan_in):
        bound = 1.0 / jnp.sqrt(jnp.float32(fan_in))
        return jax.random.uniform(k, shape, jnp.float32, -bound, bound)

    conv_w = u(ks[0], (1, 1, 3), 3)      # Conv1d weight (out_c, in_c, k)
    conv_b = u(ks[1], (1,), 3)
    fc1_w = u(ks[2], (128, 391), 391)    # Linear weight (out, in)
    fc1_b = u(ks[3], (128,), 391)
    fc2_w = u(ks[4], (64, 128), 128)
    fc2_b = u(ks[5], (64,), 128)
    fc3_w = u(ks[6], (10, 64), 64)
    fc3_b = u(ks[7], (10,), 64)
    return (conv_w, conv_b, fc1_w, fc1_b, fc2_w, fc2_b, fc3_w, fc3_b)


def pack_params(raw):
    """Repack PyTorch-layout params into kernel-ready (folded / padded / bf16) form."""
    conv_w, conv_b, fc1_w, fc1_b, fc2_w, fc2_b, fc3_w, fc3_b = raw

    cw = conv_w.reshape(3).astype(jnp.float32)            # (3,)  SMEM scalars
    cb = conv_b.astype(jnp.float32)                       # (1,)

    # Fold AvgPool1d(2,2) into fc1:  h1 = relu(conv) @ W1f
    #   W1f[2j] = W1f[2j+1] = 0.5 * fc1_w.T[j]   for j < 391; rows 782..895 are zero
    #   (they mask the conv wrap/pad junk lanes).
    w1f = jnp.concatenate(
        [jnp.repeat(0.5 * fc1_w.T, 2, axis=0),                       # (782, 128)
         jnp.zeros((X_PAD - 2 * 391, 128), jnp.float32)], axis=0)    # (896, 128)

    w2 = fc2_w.T                                                     # (128, 64)
    w3 = jnp.pad(fc3_w.T, ((0, 0), (0, OUT_PAD - 10)))               # (64, 128)
    b3 = jnp.pad(fc3_b, (0, OUT_PAD - 10))                           # (128,)

    return (cw, cb,
            w1f.astype(jnp.bfloat16), fc1_b.reshape(1, 128).astype(jnp.float32),
            w2.astype(jnp.bfloat16), fc2_b.reshape(1, 64).astype(jnp.float32),
            w3.astype(jnp.bfloat16), b3.reshape(1, OUT_PAD).astype(jnp.float32))


def net_reference(x, raw):
    """Pure-JAX f32 reference matching the PyTorch forward pass exactly."""
    conv_w, conv_b, fc1_w, fc1_b, fc2_w, fc2_b, fc3_w, fc3_b = raw
    w = conv_w.reshape(3)
    y = jnp.maximum(
        x[:, 0:782] * w[0] + x[:, 1:783] * w[1] + x[:, 2:784] * w[2] + conv_b[0], 0.0)
    p = 0.5 * (y[:, 0:782:2] + y[:, 1:782:2])              # AvgPool1d(2, 2)
    h1 = jnp.maximum(p @ fc1_w.T + fc1_b, 0.0)
    h2 = jnp.maximum(h1 @ fc2_w.T + fc2_b, 0.0)
    return h2 @ fc3_w.T + fc3_b


if __name__ == "__main__":
    key = jax.random.PRNGKey(0)
    k_x, k_p = jax.random.split(key)

    B = 2
    x = jax.random.normal(k_x, (B, X_IN), dtype=jnp.float32)  # == (B,1,28,28) flattened
    raw = init_params(k_p)
    packed = pack_params(raw)

    out = net_forward(x, packed)
    out = jax.block_until_ready(out)

    ref = net_reference(x, raw)
    assert out.shape == (B, 10), out.shape
    # Tolerance reflects bf16 MXU operands (f32 accumulation) in the kernel.
    assert jnp.allclose(out, ref, atol=2e-2, rtol=2e-2), (
        f"mismatch: max abs err = {jnp.max(jnp.abs(out - ref))}")

    print("KERNEL_OK")
</pallas_src>

<mosaic_0001>
module attributes {stable_mosaic.version = 11 : i64} {
  func.func @net_kernel(%arg0: i32, %arg1: memref<8x896xbf16, #tpu.memory_space<vmem>>, %arg2: memref<3xf32, #tpu.memory_space<smem>>, %arg3: memref<1xf32, #tpu.memory_space<smem>>, %arg4: memref<896x128xbf16, #tpu.memory_space<vmem>>, %arg5: memref<1x128xf32, #tpu.memory_space<vmem>>, %arg6: memref<128x64xbf16, #tpu.memory_space<vmem>>, %arg7: memref<1x64xf32, #tpu.memory_space<vmem>>, %arg8: memref<64x128xbf16, #tpu.memory_space<vmem>>, %arg9: memref<1x128xf32, #tpu.memory_space<vmem>>, %arg10: memref<8x128xf32, #tpu.memory_space<vmem>>) attributes {dimension_semantics = [#tpu.dimension_semantics<parallel>], iteration_bounds = array<i64: 1>, scalar_prefetch = 0 : i64, scratch_operands = 0 : i64, tpu.core_type = #tpu.core_type<tc>, window_params = [{transform_indices = @transform_0, window_bounds = array<i64: 8, 896>}, {transform_indices = @transform_1, window_bounds = array<i64: 3>}, {transform_indices = @transform_2, window_bounds = array<i64: 1>}, {pipeline_mode = #tpu.pipeline_mode<synchronous>, transform_indices = @transform_3, window_bounds = array<i64: 896, 128>}, {pipeline_mode = #tpu.pipeline_mode<synchronous>, transform_indices = @transform_4, window_bounds = array<i64: 1, 128>}, {pipeline_mode = #tpu.pipeline_mode<synchronous>, transform_indices = @transform_5, window_bounds = array<i64: 128, 64>}, {pipeline_mode = #tpu.pipeline_mode<synchronous>, transform_indices = @transform_6, window_bounds = array<i64: 1, 64>}, {pipeline_mode = #tpu.pipeline_mode<synchronous>, transform_indices = @transform_7, window_bounds = array<i64: 64, 128>}, {pipeline_mode = #tpu.pipeline_mode<synchronous>, transform_indices = @transform_8, window_bounds = array<i64: 1, 128>}, {transform_indices = @transform_9, window_bounds = array<i64: 8, 128>}]} {
    %c0 = arith.constant 0 : index
    %c0_0 = arith.constant 0 : index
    %0 = vector.load %arg1[%c0, %c0_0] : memref<8x896xbf16, #tpu.memory_space<vmem>>, vector<8x896xbf16>
    %1 = arith.extf %0 : vector<8x896xbf16> to vector<8x896xf32>
    %c0_1 = arith.constant 0 : index
    %2 = memref.load %arg2[%c0_1] : memref<3xf32, #tpu.memory_space<smem>>
    %c1 = arith.constant 1 : index
    %3 = memref.load %arg2[%c1] : memref<3xf32, #tpu.memory_space<smem>>
    %c2 = arith.constant 2 : index
    %4 = memref.load %arg2[%c2] : memref<3xf32, #tpu.memory_space<smem>>
    %c0_2 = arith.constant 0 : index
    %5 = memref.load %arg3[%c0_2] : memref<1xf32, #tpu.memory_space<smem>>
    %c895_i32 = arith.constant 895 : i32
    %6 = tpu.dynamic_rotate %1 by %c895_i32 dim 1 : vector<8x896xf32>, i32 -> vector<8x896xf32>
    %c894_i32 = arith.constant 894 : i32
    %7 = tpu.dynamic_rotate %1 by %c894_i32 dim 1 : vector<8x896xf32>, i32 -> vector<8x896xf32>
    %8 = vector.broadcast %2 : f32 to vector<8x896xf32>
    %9 = arith.mulf %1, %8 : vector<8x896xf32>
    %10 = vector.broadcast %3 : f32 to vector<8x896xf32>
    %11 = arith.mulf %6, %10 : vector<8x896xf32>
    %12 = arith.addf %9, %11 : vector<8x896xf32>
    %13 = vector.broadcast %4 : f32 to vector<8x896xf32>
    %14 = arith.mulf %7, %13 : vector<8x896xf32>
    %15 = arith.addf %12, %14 : vector<8x896xf32>
    %16 = vector.broadcast %5 : f32 to vector<8x896xf32>
    %17 = arith.addf %15, %16 : vector<8x896xf32>
    %cst = arith.constant 0.000000e+00 : f32
    %18 = vector.broadcast %cst : f32 to vector<8x896xf32>
    %19 = arith.maximumf %17, %18 : vector<8x896xf32>
    %20 = arith.truncf %19 : vector<8x896xf32> to vector<8x896xbf16>
    %c0_3 = arith.constant 0 : index
    %c0_4 = arith.constant 0 : index
    %21 = vector.load %arg4[%c0_3, %c0_4] : memref<896x128xbf16, #tpu.memory_space<vmem>>, vector<896x128xbf16>
    %cst_5 = arith.constant dense<0.000000e+00> : vector<8x128xf32>
    %22 = tpu.matmul %20, %21, %cst_5 {dimension_numbers = #tpu.dot_dimension_numbers<[1], [0], [0], [1], [0, 0, 1, 1], [], []>} : vector<8x896xbf16>, vector<896x128xbf16>, vector<8x128xf32> -> vector<8x128xf32>
    %c0_6 = arith.constant 0 : index
    %c0_7 = arith.constant 0 : index
    %23 = vector.load %arg5[%c0_6, %c0_7] : memref<1x128xf32, #tpu.memory_space<vmem>>, vector<1x128xf32>
    %24 = vector.broadcast %23 : vector<1x128xf32> to vector<8x128xf32>
    %25 = arith.addf %22, %24 : vector<8x128xf32>
    %cst_8 = arith.constant 0.000000e+00 : f32
    %26 = vector.broadcast %cst_8 : f32 to vector<8x128xf32>
    %27 = arith.maximumf %25, %26 : vector<8x128xf32>
    %28 = arith.truncf %27 : vector<8x128xf32> to vector<8x128xbf16>
    %c0_9 = arith.constant 0 : index
    %c0_10 = arith.constant 0 : index
    %29 = vector.load %arg6[%c0_9, %c0_10] : memref<128x64xbf16, #tpu.memory_space<vmem>>, vector<128x64xbf16>
    %cst_11 = arith.constant dense<0.000000e+00> : vector<8x64xf32>
    %30 = tpu.matmul %28, %29, %cst_11 {dimension_numbers = #tpu.dot_dimension_numbers<[1], [0], [0], [1], [0, 0, 1, 1], [], []>} : vector<8x128xbf16>, vector<128x64xbf16>, vector<8x64xf32> -> vector<8x64xf32>
    %c0_12 = arith.constant 0 : index
    %c0_13 = arith.constant 0 : index
    %31 = vector.load %arg7[%c0_12, %c0_13] : memref<1x64xf32, #tpu.memory_space<vmem>>, vector<1x64xf32>
    %32 = vector.broadcast %31 : vector<1x64xf32> to vector<8x64xf32>
    %33 = arith.addf %30, %32 : vector<8x64xf32>
    %cst_14 = arith.constant 0.000000e+00 : f32
    %34 = vector.broadcast %cst_14 : f32 to vector<8x64xf32>
    %35 = arith.maximumf %33, %34 : vector<8x64xf32>
    %36 = arith.truncf %35 : vector<8x64xf32> to vector<8x64xbf16>
    %c0_15 = arith.constant 0 : index
    %c0_16 = arith.constant 0 : index
    %37 = vector.load %arg8[%c0_15, %c0_16] : memref<64x128xbf16, #tpu.memory_space<vmem>>, vector<64x128xbf16>
    %cst_17 = arith.constant dense<0.000000e+00> : vector<8x128xf32>
    %38 = tpu.matmul %36, %37, %cst_17 {dimension_numbers = #tpu.dot_dimension_numbers<[1], [0], [0], [1], [0, 0, 1, 1], [], []>} : vector<8x64xbf16>, vector<64x128xbf16>, vector<8x128xf32> -> vector<8x128xf32>
    %c0_18 = arith.constant 0 : index
    %c0_19 = arith.constant 0 : index
    %39 = vector.load %arg9[%c0_18, %c0_19] : memref<1x128xf32, #tpu.memory_space<vmem>>, vector<1x128xf32>
    %40 = vector.broadcast %39 : vector<1x128xf32> to vector<8x128xf32>
    %41 = arith.addf %38, %40 : vector<8x128xf32>
    %c0_20 = arith.constant 0 : index
    %c0_21 = arith.constant 0 : index
    %42 = vector.load %arg10[%c0_20, %c0_21] : memref<8x128xf32, #tpu.memory_space<vmem>>, vector<8x128xf32>
    tpu.vector_store %arg10[%c0_20, %c0_21], %41 {strides = array<i32>} : memref<8x128xf32, #tpu.memory_space<vmem>>, vector<8x128xf32>,
    return
  }
  func.func @transform_0(%arg0: i32) -> (i32, i32) {
    %c0_i32 = arith.constant 0 : i32
    %c0_i32_0 = arith.constant 0 : i32
    return %arg0, %c0_i32 : i32, i32
  }
  func.func @transform_1(%arg0: i32) -> i32 {
    %c0_i32 = arith.constant 0 : i32
    %c0_i32_0 = arith.constant 0 : i32
    return %c0_i32 : i32
  }
  func.func @transform_2(%arg0: i32) -> i32 {
    %c0_i32 = arith.constant 0 : i32
    %c0_i32_0 = arith.constant 0 : i32
    return %c0_i32 : i32
  }
  func.func @transform_3(%arg0: i32) -> (i32, i32) {
    %c0_i32 = arith.constant 0 : i32
    %c0_i32_0 = arith.constant 0 : i32
    %c0_i32_1 = arith.constant 0 : i32
    return %c0_i32, %c0_i32_0 : i32, i32
  }
  func.func @transform_4(%arg0: i32) -> (i32, i32) {
    %c0_i32 = arith.constant 0 : i32
    %c0_i32_0 = arith.constant 0 : i32
    %c0_i32_1 = arith.constant 0 : i32
    return %c0_i32, %c0_i32_0 : i32, i32
  }
  func.func @transform_5(%arg0: i32) -> (i32, i32) {
    %c0_i32 = arith.constant 0 : i32
    %c0_i32_0 = arith.constant 0 : i32
    %c0_i32_1 = arith.constant 0 : i32
    return %c0_i32, %c0_i32_0 : i32, i32
  }
  func.func @transform_6(%arg0: i32) -> (i32, i32) {
    %c0_i32 = arith.constant 0 : i32
    %c0_i32_0 = arith.constant 0 : i32
    %c0_i32_1 = arith.constant 0 : i32
    return %c0_i32, %c0_i32_0 : i32, i32
  }
  func.func @transform_7(%arg0: i32) -> (i32, i32) {
    %c0_i32 = arith.constant 0 : i32
    %c0_i32_0 = arith.constant 0 : i32
    %c0_i32_1 = arith.constant 0 : i32
    return %c0_i32, %c0_i32_0 : i32, i32
  }
  func.func @transform_8(%arg0: i32) -> (i32, i32) {
    %c0_i32 = arith.constant 0 : i32
    %c0_i32_0 = arith.constant 0 : i32
    %c0_i32_1 = arith.constant 0 : i32
    return %c0_i32, %c0_i32_0 : i32, i32
  }
  func.func @transform_9(%arg0: i32) -> (i32, i32) {
    %c0_i32 = arith.constant 0 : i32
    %c0_i32_0 = arith.constant 0 : i32
    return %arg0, %c0_i32 : i32, i32
  }
}

</mosaic_0001>

<bundles_post_ra>
// kernel: tpu_custom_call.1
= control target key start
LH: loop header
LB: loop body
LE: loop exit
PB: predicated region body
PF: predicated region fallthrough
CT: control target
= control target key end

     0   :  { %15 = vsyncpa [#allocation6], 0  ;;  %s1587_s0 = inlined_call_operand.vmem [shape: bf16[8,896], index: 0, kind: input, shape index: {}]   ;;  %s1588_s1 = inlined_call_operand.vmem [shape: f32[3], index: 1, kind: input, shape index: {}]   ;;  %s1589_s2 = inlined_call_operand.<no memory space> [shape: f32[1], index: 2, kind: input, shape index: {}]   ;;  %s1590_s3 = inlined_call_operand.hbm [shape: bf16[896,128], index: 3, kind: input, shape index: {}]   ;;  %s1591_s4 = inlined_call_operand.vmem [shape: f32[1,128], index: 4, kind: input, shape index: {}]   ;;  %s1592_s5 = inlined_call_operand.vmem [shape: bf16[128,64], index: 5, kind: input, shape index: {}]   ;;  %s1593_s6 = inlined_call_operand.vmem [shape: f32[1,64], index: 6, kind: input, shape index: {}]   ;;  %s1594_s7 = inlined_call_operand.vmem [shape: bf16[64,128], index: 7, kind: input, shape index: {}]   ;;  %s1595_s8 = inlined_call_operand.vmem [shape: f32[1,128], index: 8, kind: input, shape index: {}]   ;;  %s1596_s9 = inlined_call_operand.hbm [shape: f32[8,128], index: 9, kind: output, shape index: {}]  }
   0x1   :  { %16 = vsyncpa [#allocation4], 0 }
   0x2   :  { %17 = vsyncpa [#allocation5], 0  ;;  %s25_s11 = sshll.u32 %s1588_s1, 4  ;;  %s35_s14 = sshll.u32 %s1590_s3, 4  ;;  %s26_s11 = int_to_ptr.vmem [resolvable:$true] %s25_s11  ;;  %s36_s14 = int_to_ptr.hbm [resolvable:$true] %s35_s14 }
   0x3   :  { %s1334_s15 = smov [#allocation3]   ;;  %s1335_s16 = smov [#allocation7]  }
   0x4   :  { %28 = dma.vmem_to_smem %s26_s11, 16, %s1334_s15, [#allocation6]  }
   0x5   :  { %s37_s17 = sshll.u32 %s1335_s16, 4  ;;  %s1336_s18 = smov 64   ;;  %s38_s17 = int_to_ptr.vmem [resolvable:$true] %s37_s17 }
   0x6   :  { %s1337_s19 = smov 4  }
   0x7   :  { %43 = dma.hbm_to_vmem [thread:$0]  %s36_s14, 7168, %s38_s17, [#allocation4], %s1336_s18, %s1336_s18, %s1337_s19  }
   0x8   :  { %1328 = dma.done.wait [#allocation6], 16  }
   0x9   :  { %1329 = vsyncadd [#allocation6], 4294967280 }
   0xa   :  { %1330 = dma.done.wait [#allocation4], 7168  }
   0xb   :  { %1331 = vsyncadd [#allocation4], 4294960128 }
   0xc   :  { %62 = sfence }
   0xd   :  { %v1400_v0 = vld [vmem:[%s1587_s0 + $0x8] sm:$0xff]  ;;  %v66_v3 = vld [vmem:[%s1587_s0 + $0x10] sm:$0xff]  ;;  %v67_v4 = vld [vmem:[%s1587_s0 + $0x18] sm:$0xf]  ;;  %s1339_s26 = smov 127   ;;  %s885_s27 = sld [smem:[#allocation3 + $0x1]]  ;;  %v93_v62 = vlaneseq }
   0xe   :  { %v70_v1 = vunpack.c.l.bf16 %v1400_v0  ;;  %v71_v2 = vunpack.c.h.bf16 %v1400_v0  ;;  %v1183_v5 = vld [vmem:[#allocation7 + $0xb8] sm:$0xff]  ;;  %v1413_v6 = vld [vmem:[%s1587_s0] sm:$0xff]  ;;  %v1415_v7 = vunpack.c.l.bf16 %v67_v4  ;;  %v1417_v8 = vunpack.c.l.bf16 %v66_v3  ;;  %v1182_v12 = vld [vmem:[#allocation7 + $0xb0] sm:$0xff]  ;;  %s1338_s0 = smov 126   ;;  %s75_s28 = sld [smem:[#allocation3]] }
   0xf   :  { %v1167_v9 = vld [vmem:[#allocation7 + $0x38] sm:$0xff]  ;;  %663 = vmatpush.bf16.msra.mxu2 %v1183_v5  ;;  %v1166_v14 = vld [vmem:[#allocation7 + $0x30] sm:$0xff]  ;;  %v68_v17 = vunpack.c.l.bf16 %v1413_v6  ;;  %v69_v18 = vunpack.c.h.bf16 %v1413_v6  ;;  %v1181_v20 = vld [vmem:[#allocation7 + $0xa8] sm:$0xff]  ;;  %v1436_v28 = vunpack.c.h.bf16 %v66_v3  ;;  %s886_s29 = sld [smem:[#allocation3 + $0x2]]  ;;  %vm849_vm2 = vcmask 523264   ;;  %s1340_s13 = smov [#allocation8]  }
  0x10   :  { %v1175_v10 = vld [vmem:[#allocation7 + $0x78] sm:$0xff]  ;;  %v1245_v11 = vpack.i.bf16 %v71_v2, %v70_v1  ;;  %v1255_v13 = vpack.i.bf16 %v1415_v7, %v1417_v8  ;;  %637 = vmatpush.bf16.msra.mxu0 %v1167_v9  ;;  %v1174_v15 = vld [vmem:[#allocation7 + $0x70] sm:$0xff]  ;;  %v1165_v21 = vld [vmem:[#allocation7 + $0x28] sm:$0xff]  ;;  %s872_s14 = sshll.u32 %s1340_s13, 4  ;;  %s874_s16 = sshll.u32 %s1596_s9, 4  ;;  %s873_s14 = int_to_ptr.vmem [resolvable:$true] %s872_s14  ;;  %s875_s16 = int_to_ptr.hbm [resolvable:$true] %s874_s16 }
  0x11   :  { %650 = vmatpush.bf16.msra.mxu1 %v1175_v10  ;;  %v1191_v16 = vld [vmem:[#allocation7 + $0xf8] sm:$0xff]  ;;  %v1190_v19 = vld [vmem:[#allocation7 + $0xf0] sm:$0xff]  ;;  %v1173_v22 = vld [vmem:[#allocation7 + $0x68] sm:$0xff]  ;;  %v1250_v23 = vpack.i.bf16 %v69_v18, %v68_v17  ;;  %v1260_v32 = vpack.i.bf16 %v1436_v28, %v1415_v7 }
  0x12   :  { %1246 = vrot.lane.b32.xlu1 %v1245_v11, %s1338_s0  ;;  %1236 = vrot.lane.b32.xlu0 %v1245_v11, %s1339_s26  ;;  %v1189_v24 = vld [vmem:[#allocation7 + $0xe8] sm:$0xff]  ;;  %v1180_v25 = vld [vmem:[#allocation7 + $0xa0] sm:$0xff]  ;;  %v1179_v29 = vld [vmem:[#allocation7 + $0x98] sm:$0xff]  ;;  %v1447_v11 = vand.u32 127, %v93_v62 }
  0x13   :  { %1256 = vrot.lane.b32.xlu2 %v1255_v13, %s1339_s26  ;;  %676 = vmatpush.bf16.msra.mxu3 %v1191_v16  ;;  %v1164_v26 = vld [vmem:[#allocation7 + $0x20] sm:$0xff]  ;;  %v1163_v30 = vld [vmem:[#allocation7 + $0x18] sm:$0xff]  ;;  %v1178_v33 = vld [vmem:[#allocation7 + $0x90] sm:$0xff]  ;;  %v1456_v16 = vstv %s885_s27 }
  0x14   :  { %664 = vmatpush.bf16.msra.mxu2 %v1182_v12  ;;  %638 = vmatpush.bf16.msra.mxu0 %v1166_v14  ;;  %v1172_v27 = vld [vmem:[#allocation7 + $0x60] sm:$0xff]  ;;  %v1171_v31 = vld [vmem:[#allocation7 + $0x58] sm:$0xff]  ;;  %v1177_v34 = vld [vmem:[#allocation7 + $0x88] sm:$0xff]  ;;  %v1452_v14 = vstv %s75_s28  ;;  %vm117_vm0 = vcmp.lt.s32.totalorder %v1447_v11, 126  ;;  %vm95_vm1 = vcmp.lt.s32.totalorder %v1447_v11, 127 }
  0x15   :  { %651 = vmatpush.bf16.msra.mxu1 %v1174_v15  ;;  %v1188_v35 = vld [vmem:[#allocation7 + $0xe0] sm:$0xff]  ;;  %v1162_v36 = vld [vmem:[#allocation7 + $0x10] sm:$0xff]  ;;  %v1187_v39 = vld [vmem:[#allocation7 + $0xd8] sm:$0xff] }
  0x16   :  { %v1170_v37 = vld [vmem:[#allocation7 + $0x50] sm:$0xff]  ;;  %v1176_v38 = vld [vmem:[#allocation7 + $0x80] sm:$0xff]  ;;  %v1215_v40 = vld [vmem:[#allocation7 + $0x1b8] sm:$0xff] }
  0x17   :  { %677 = vmatpush.bf16.msra.mxu3 %v1190_v19  ;;  %v1161_v41 = vld [vmem:[#allocation7 + $0x8] sm:$0xff]  ;;  %v1186_v43 = vld [vmem:[#allocation7 + $0xd0] sm:$0xff]  ;;  %v1160_v45 = vld [vmem:[#allocation7] sm:$0xff] }
  0x18   :  { %665 = vmatpush.bf16.msra.mxu2 %v1181_v20  ;;  %639 = vmatpush.bf16.msra.mxu0 %v1165_v21  ;;  %v1169_v42 = vld [vmem:[#allocation7 + $0x48] sm:$0xff]  ;;  %v1214_v44 = vld [vmem:[#allocation7 + $0x1b0] sm:$0xff]  ;;  %v1168_v46 = vld [vmem:[#allocation7 + $0x40] sm:$0xff]  ;;  %v1458_v20 = vstv %s886_s29 }
  0x19   :  { %652 = vmatpush.bf16.msra.mxu1 %v1173_v22  ;;  %v1185_v47 = vld [vmem:[#allocation7 + $0xc8] sm:$0xff]  ;;  %v1199_v48 = vld [vmem:[#allocation7 + $0x138] sm:$0xff]  ;;  %v1184_v51 = vld [vmem:[#allocation7 + $0xc0] sm:$0xff] }
  0x1a   :  { %1251 = vrot.lane.b32.xlu1 %v1250_v23, %s1338_s0  ;;  %1241 = vrot.lane.b32.xlu0 %v1250_v23, %s1339_s26  ;;  %v1207_v49 = vld [vmem:[#allocation7 + $0x178] sm:$0xff]  ;;  %v1213_v50 = vld [vmem:[#allocation7 + $0x1a8] sm:$0xff]  ;;  %v1198_v52 = vld [vmem:[#allocation7 + $0x130] sm:$0xff] }
  0x1b   :  { %111 = vrot.lane.b32.xlu2 %v1417_v8, %s1338_s0  ;;  %678 = vmatpush.bf16.msra.mxu3 %v1189_v24  ;;  %v1206_v53 = vld [vmem:[#allocation7 + $0x170] sm:$0xff]  ;;  %v1212_v54 = vld [vmem:[#allocation7 + $0x1a0] sm:$0xff]  ;;  %v1197_v55 = vld [vmem:[#allocation7 + $0x128] sm:$0xff] }
  0x1c   :  { %666 = vmatpush.bf16.msra.mxu2 %v1180_v25  ;;  %640 = vmatpush.bf16.msra.mxu0 %v1164_v26  ;;  %v1205_v56 = vld [vmem:[#allocation7 + $0x168] sm:$0xff]  ;;  %v1211_v57 = vld [vmem:[#allocation7 + $0x198] sm:$0xff]  ;;  %v1196_v58 = vld [vmem:[#allocation7 + $0x120] sm:$0xff] }
  0x1d   :  { %653 = vmatpush.bf16.msra.mxu1 %v1172_v27  ;;  %v1204_v59 = vld [vmem:[#allocation7 + $0x160] sm:$0xff]  ;;  %v1210_v60 = vld [vmem:[#allocation7 + $0x190] sm:$0xff]  ;;  %v1195_v63 = vld [vmem:[#allocation7 + $0x118] sm:$0xff]  ;;  %v128_v27 = vmul.f32 %v1452_v14, %v70_v1 }
  0x1e   :  { %v1203_v3 = vld [vmem:[#allocation7 + $0x158] sm:$0xff]  ;;  %v1209_v4 = vld [vmem:[#allocation7 + $0x188] sm:$0xff]  ;;  %v1194_v5 = vld [vmem:[#allocation7 + $0x110] sm:$0xff] }
  0x1f   :  { %679 = vmatpush.bf16.msra.mxu3 %v1188_v35  ;;  %v1202_v9 = vld [vmem:[#allocation7 + $0x150] sm:$0xff]  ;;  %v1208_v10 = vld [vmem:[#allocation7 + $0x180] sm:$0xff]  ;;  %v1193_v21 = vld [vmem:[#allocation7 + $0x108] sm:$0xff] }
  0x20   :  { %667 = vmatpush.bf16.msra.mxu2 %v1179_v29  ;;  %641 = vmatpush.bf16.msra.mxu0 %v1163_v30  ;;  %v1201_v22 = vld [vmem:[#allocation7 + $0x148] sm:$0xff]  ;;  %v129_v29 = vmul.f32 %v1452_v14, %v71_v2  ;;  %v1192_v30 = vld [vmem:[#allocation7 + $0x100] sm:$0xff] }
  0x21   :  { %654 = vmatpush.bf16.msra.mxu1 %v1171_v31  ;;  %v1200_v0 = vld [vmem:[#allocation7 + $0x140] sm:$0xff] }
  0x22   :  { %1261 = vrot.lane.b32.xlu1 %v1260_v32, %s1338_s0  ;;  %89 = vrot.lane.b32.xlu0 %v1436_v28, %s1339_s26 }
  0x23   :  { %680 = vmatpush.bf16.msra.mxu3 %v1187_v39  ;;  %v1484_v39 = vstv %s1589_s2 }
  0x24   :  { %668 = vmatpush.bf16.msra.mxu2 %v1178_v33  ;;  %642 = vmatpush.bf16.msra.mxu0 %v1162_v36 }
  0x25   :  { %655 = vmatpush.bf16.msra.mxu1 %v1170_v37 }
  0x27   :  { %681 = vmatpush.bf16.msra.mxu3 %v1186_v43 }
  0x28   :  { %669 = vmatpush.bf16.msra.mxu2 %v1177_v34  ;;  %643 = vmatpush.bf16.msra.mxu0 %v1161_v41 }
  0x29   :  { %656 = vmatpush.bf16.msra.mxu1 %v1169_v42 }
  0x2b   :  { %682 = vmatpush.bf16.msra.mxu3 %v1185_v47 }
  0x2c   :  { %670 = vmatpush.bf16.msra.mxu2 %v1176_v38  ;;  %644 = vmatpush.bf16.msra.mxu0 %v1160_v45 }
  0x2d   :  { %657 = vmatpush.bf16.msra.mxu1 %v1168_v46 }
  0x2f   :  { %683 = vmatpush.bf16.msra.mxu3 %v1184_v51 }
  0x30   :  { %715 = vmatpush.bf16.msrb.mxu2 %v1215_v40  ;;  %689 = vmatpush.bf16.msrb.mxu0 %v1199_v48 }
  0x31   :  { %702 = vmatpush.bf16.msrb.mxu1 %v1207_v49  ;;  %v1223_v49 = vld [vmem:[%s1592_s5 + $0x38] sm:$0xff] }
  0x33   :  { %798 = vmatpush.bf16.msrb.mxu3 %v1223_v49  ;;  %v1219_v49 = vld [vmem:[%s1592_s5 + $0x18] sm:$0xff] }
  0x34   :  { %716 = vmatpush.bf16.msrb.mxu2 %v1214_v44  ;;  %690 = vmatpush.bf16.msrb.mxu0 %v1198_v52  ;;  %v126_v52 = vmul.f32 %v1452_v14, %v68_v17 }
  0x35   :  { %703 = vmatpush.bf16.msrb.mxu1 %v1206_v53  ;;  %v127_v53 = vmul.f32 %v1452_v14, %v69_v18 }
  0x38   :  { %717 = vmatpush.bf16.msrb.mxu2 %v1213_v50  ;;  %691 = vmatpush.bf16.msrb.mxu0 %v1197_v55 }
  0x39   :  { %704 = vmatpush.bf16.msrb.mxu1 %v1205_v56 }
  0x3c   :  { %718 = vmatpush.bf16.msrb.mxu2 %v1212_v54  ;;  %692 = vmatpush.bf16.msrb.mxu0 %v1196_v58 }
  0x3d   :  { %705 = vmatpush.bf16.msrb.mxu1 %v1204_v59 }
  0x40   :  { %719 = vmatpush.bf16.msrb.mxu2 %v1211_v57  ;;  %693 = vmatpush.bf16.msrb.mxu0 %v1195_v63 }
  0x41   :  { %706 = vmatpush.bf16.msrb.mxu1 %v1203_v3 }
  0x44   :  { %720 = vmatpush.bf16.msrb.mxu2 %v1210_v60  ;;  %694 = vmatpush.bf16.msrb.mxu0 %v1194_v5 }
  0x45   :  { %707 = vmatpush.bf16.msrb.mxu1 %v1202_v9  ;;  %v132_v9 = vmul.f32 %v1452_v14, %v1415_v7 }
  0x48   :  { %721 = vmatpush.bf16.msrb.mxu2 %v1209_v4  ;;  %695 = vmatpush.bf16.msrb.mxu0 %v1193_v21 }
  0x49   :  { %708 = vmatpush.bf16.msrb.mxu1 %v1201_v22 }
  0x4c   :  { %722 = vmatpush.bf16.msrb.mxu2 %v1208_v10  ;;  %696 = vmatpush.bf16.msrb.mxu0 %v1192_v30 }
  0x4d   :  { %709 = vmatpush.bf16.msrb.mxu1 %v1200_v0 }
  0x6d   :  { %v1445_v61 = vpop.permute.xlu2 %1256 }
  0x6e   :  { %v1258_v12 = vunpack.i.l.bf16 %v1445_v61  ;;  %v1259_v40 = vunpack.i.h.bf16 %v1445_v61 }
  0x75   :  { %v1450_v13 = vpop.permute.xlu2 %111 }
  0x84   :  { %v1247_v15 = vpop.permute.xlu1 %1246  ;;  %v1237_v19 = vpop.permute.xlu0 %1236 }
  0x85   :  { %v1249_v23 = vunpack.i.h.bf16 %v1247_v15  ;;  %v1248_v24 = vunpack.i.l.bf16 %v1247_v15  ;;  %v1239_v25 = vunpack.i.h.bf16 %v1237_v19  ;;  %v1238_v26 = vunpack.i.l.bf16 %v1237_v19 }
  0x86   :  { %v130_v19 = vmul.f32 %v1452_v14, %v1417_v8 }
  0x87   :  { %v121_v31 = vsel %vm117_vm0, %v1248_v24, %v1249_v23  ;;  %v98_v32 = vsel %vm95_vm1, %v1239_v25, %v1258_v12  ;;  %v99_v33 = vsel %vm95_vm1, %v1238_v26, %v1239_v25  ;;  %v120_v1 = vsel %vm117_vm0, %v1249_v23, %v1450_v13 }
  0x88   :  { %v137_v2 = vmul.f32 %v1456_v16, %v98_v32  ;;  %v136_v34 = vmul.f32 %v1456_v16, %v99_v33  ;;  %v152_v35 = vmul.f32 %v1458_v20, %v120_v1  ;;  %v151_v36 = vmul.f32 %v1458_v20, %v121_v31 }
  0x8a   :  { %v143_v37 = vadd.f32 %v136_v34, %v128_v27  ;;  %v144_v38 = vadd.f32 %v137_v2, %v129_v29  ;;  %v131_v27 = vmul.f32 %v1452_v14, %v1436_v28 }
  0x8c   :  { %v1252_v41 = vpop.permute.xlu1 %1251  ;;  %v1242_v42 = vpop.permute.xlu0 %1241  ;;  %v158_v43 = vadd.f32 %v151_v36, %v143_v37  ;;  %v159_v44 = vadd.f32 %v152_v35, %v144_v38 }
  0x8d   :  { %v1254_v45 = vunpack.i.h.bf16 %v1252_v41  ;;  %v1253_v46 = vunpack.i.l.bf16 %v1252_v41  ;;  %v1244_v47 = vunpack.i.h.bf16 %v1242_v42  ;;  %v1243_v48 = vunpack.i.l.bf16 %v1242_v42 }
  0x8e   :  { %v166_v50 = vadd.f32 %v1484_v39, %v158_v43  ;;  %v167_v51 = vadd.f32 %v1484_v39, %v159_v44 }
  0x8f   :  { %v122_v54 = vsel %vm117_vm0, %v1254_v45, %v1248_v24  ;;  %v123_v55 = vsel %vm117_vm0, %v1253_v46, %v1254_v45  ;;  %v100_v56 = vsel %vm95_vm1, %v1244_v47, %v1238_v26  ;;  %v101_v57 = vsel %vm95_vm1, %v1243_v48, %v1244_v47  ;;  %v1222_v47 = vld [vmem:[%s1592_s5 + $0x30] sm:$0xff] }
  0x90   :  { %v135_v58 = vmul.f32 %v1456_v16, %v100_v56  ;;  %v134_v17 = vmul.f32 %v1456_v16, %v101_v57  ;;  %v173_v6 = vmax.f32 %v166_v50, 0.0  ;;  %v102_v18 = vsel %vm95_vm1, %v1259_v40, %v1243_v48  ;;  %799 = vmatpush.bf16.msrb.mxu3 %v1222_v47  ;;  %v1221_v48 = vld [vmem:[%s1592_s5 + $0x28] sm:$0xff]  ;;  %v1218_v50 = vld [vmem:[%s1592_s5 + $0x10] sm:$0xff]  ;;  %v1265_v57 = vld [vmem:[%s1591_s4] ss:$0 sm:$0xff] }
  0x91   :  { %v174_v59 = vmax.f32 %v167_v51, 0.0  ;;  %v149_v60 = vmul.f32 %v1458_v20, %v123_v55  ;;  %v150_v4 = vmul.f32 %v1458_v20, %v122_v54  ;;  %v140_v10 = vmul.f32 %v1456_v16, %v102_v18  ;;  %v1217_v51 = vld [vmem:[%s1592_s5 + $0x8] sm:$0xff]  ;;  %v1226_v55 = vld [vmem:[%s1594_s7 + $0x10] sm:$0xff] }
  0x92   :  { %v180_v62 = vpack.c.bf16 %v173_v6, %v173_v6  ;;  %v141_v63 = vadd.f32 %v134_v17, %v126_v52  ;;  %v142_v3 = vadd.f32 %v135_v58, %v127_v53  ;;  %v1216_v52 = vld [vmem:[%s1592_s5] sm:$0xff]  ;;  %v1227_v53 = vld [vmem:[%s1594_s7 + $0x18] sm:$0xff]  ;;  %v1225_v6 = vld [vmem:[%s1594_s7 + $0x8] sm:$0xff] }
  0x93   :  { %v181_v5 = vpack.c.bf16 %v174_v59, %v174_v59  ;;  %v147_v14 = vadd.f32 %v140_v10, %v132_v9 }
  0x94   :  { %671 = vmatmul.bf16.vlgmr.msra.gmra.mxu2 %v180_v62  ;;  %v1262_v15 = vpop.permute.xlu1 %1261  ;;  %v90_v21 = vpop.permute.xlu0 %89  ;;  %v156_v22 = vadd.f32 %v149_v60, %v141_v63  ;;  %v157_v23 = vadd.f32 %v150_v4, %v142_v3  ;;  %800 = vmatpush.bf16.msrb.mxu3 %v1221_v48 }
  0x95   :  { %684 = vmatmul.bf16.vlgmr.msra.gmra.mxu3 %v181_v5  ;;  %v1264_v24 = vunpack.i.h.bf16 %v1262_v15  ;;  %v1263_v25 = vunpack.i.l.bf16 %v1262_v15  ;;  %v96_v26 = vsel %vm95_vm1, %v90_v21, %v1259_v40  ;;  %v97_v7 = vsel %vm95_vm1, %v1258_v12, %v90_v21 }
  0x96   :  { %v138_v29 = vmul.f32 %v1456_v16, %v97_v7  ;;  %v164_v8 = vadd.f32 %v1484_v39, %v156_v22  ;;  %v165_v30 = vadd.f32 %v1484_v39, %v157_v23  ;;  %v139_v12 = vmul.f32 %v1456_v16, %v96_v26 }
  0x97   :  { %v119_v31 = vsel %vm117_vm0, %v1450_v13, %v1264_v24  ;;  %v118_v32 = vsel %vm117_vm0, %v1264_v24, %v1263_v25  ;;  %v124_v61 = vsel %vm117_vm0, %v1263_v25, %v1253_v46 }
  0x98   :  { %v155_v28 = vmul.f32 %v1458_v20, %v124_v61  ;;  %v171_v33 = vmax.f32 %v164_v8, 0.0  ;;  %v172_v1 = vmax.f32 %v165_v30, 0.0  ;;  %v153_v0 = vmul.f32 %v1458_v20, %v119_v31 }
  0x99   :  { %v154_v2 = vmul.f32 %v1458_v20, %v118_v32  ;;  %v145_v35 = vadd.f32 %v138_v29, %v130_v19  ;;  %v146_v13 = vadd.f32 %v139_v12, %v131_v27  ;;  %v1224_v27 = vld [vmem:[%s1594_s7] sm:$0xff] }
  0x9a   :  { %v162_v34 = vadd.f32 %v155_v28, %v147_v14  ;;  %v178_v36 = vpack.c.bf16 %v171_v33, %v171_v33  ;;  %v179_v37 = vpack.c.bf16 %v172_v1, %v172_v1  ;;  %v1266_v29 = vld [vmem:[%s1593_s6] ss:$0 sm:$0xff] }
  0x9b   :  { %v160_v16 = vadd.f32 %v153_v0, %v145_v35  ;;  %v161_v40 = vadd.f32 %v154_v2, %v146_v13  ;;  %v1267_v12 = vld [vmem:[%s1595_s8] ss:$0 sm:$0xff] }
  0x9c   :  { %v170_v38 = vadd.f32 %v1484_v39, %v162_v34  ;;  %645 = vmatmul.bf16.vlgmr.msra.gmra.mxu0 %v178_v36  ;;  %658 = vmatmul.bf16.vlgmr.msra.gmra.mxu1 %v179_v37 }
  0x9d   :  { %v168_v42 = vadd.f32 %v1484_v39, %v160_v16  ;;  %v169_v43 = vadd.f32 %v1484_v39, %v161_v40  ;;  %v1220_v39 = vld [vmem:[%s1592_s5 + $0x20] sm:$0xff]  ;;  %857 = vmatpush.bf16.msra.mxu0 %v1227_v53 }
  0x9e   :  { %v177_v11 = vmax.f32 %v170_v38, 0.0  ;;  %801 = vmatpush.bf16.msrb.mxu3 %v1220_v39 }
  0x9f   :  { %v175_v44 = vmax.f32 %v168_v42, 0.0  ;;  %v176_v20 = vmax.f32 %v169_v43, 0.0 }
  0xa0   :  { %v184_v41 = vpack.c.bf16 %v177_v11, %v177_v11 }
  0xa1   :  { %v182_v45 = vpack.c.bf16 %v175_v44, %v175_v44  ;;  %v183_v46 = vpack.c.bf16 %v176_v20, %v176_v20  ;;  %858 = vmatpush.bf16.msra.mxu0 %v1226_v55 }
  0xa2   :  { %802 = vmatpush.bf16.msrb.mxu3 %v1219_v49 }
  0xa4   :  { %723 = vmatmul.bf16.vlgmr.msrb.gmra.mxu2 %v184_v41 }
  0xa5   :  { %859 = vmatpush.bf16.msra.mxu0 %v1225_v6 }
  0xa6   :  { %803 = vmatpush.bf16.msrb.mxu3 %v1218_v50 }
  0xa9   :  { %860 = vmatpush.bf16.msra.mxu0 %v1224_v27 }
  0xaa   :  { %804 = vmatpush.bf16.msrb.mxu3 %v1217_v51 }
  0xac   :  { %697 = vmatmul.bf16.vlgmr.msrb.gmra.mxu0 %v182_v45  ;;  %710 = vmatmul.bf16.vlgmr.msrb.gmra.mxu1 %v183_v46 }
  0xae   :  { %805 = vmatpush.bf16.msrb.mxu3 %v1216_v52 }
 0x117   :  { %v672_v54 = vpop.f32.mrf.mxu2 }
 0x118   :  { %v685_v56 = vpop.f32.mrf.mxu3 }
 0x119   :  { %v646_v58 = vpop.f32.mrf.mxu0  ;;  %v659_v17 = vpop.f32.mrf.mxu1 }
 0x11a   :  { %v647_v18 = vadd.f32 %v1265_v57, %v646_v58 }
 0x11c   :  { %v660_v62 = vadd.f32 %v659_v17, %v647_v18 }
 0x11e   :  { %v673_v4 = vadd.f32 %v672_v54, %v660_v62 }
 0x11f   :  { %v674_v59 = vpop.f32.mrf.mxu2 }
 0x120   :  { %v687_v60 = vpop.f32.mrf.mxu3  ;;  %v686_v9 = vadd.f32 %v685_v56, %v673_v4 }
 0x121   :  { %v648_v63 = vpop.f32.mrf.mxu0  ;;  %v661_v3 = vpop.f32.mrf.mxu1 }
 0x127   :  { %v724_v5 = vpop.f32.mrf.mxu2 }
 0x129   :  { %v698_v10 = vpop.f32.mrf.mxu0  ;;  %v711_v15 = vpop.f32.mrf.mxu1 }
 0x12a   :  { %v699_v19 = vadd.f32 %v698_v10, %v686_v9 }
 0x12c   :  { %v712_v21 = vadd.f32 %v711_v15, %v699_v19 }
 0x12e   :  { %v725_v22 = vadd.f32 %v724_v5, %v712_v21 }
 0x12f   :  { %v726_v23 = vpop.f32.mrf.mxu2 }
 0x130   :  { %v728_v24 = vmax.f32 %v725_v22, 0.0 }
 0x131   :  { %v700_v25 = vpop.f32.mrf.mxu0  ;;  %v713_v26 = vpop.f32.mrf.mxu1 }
 0x132   :  { %v729_v7 = vpack.c.bf16 %v728_v24, %v728_v24 }
 0x134   :  { %806 = vmatmul.bf16.vlgmr.msrb.gmra.mxu3 %v729_v7 }
 0x1b7   :  { %v807_v8 = vpop.f32.mrf.mxu3 }
 0x1b8   :  { %v808_v30 = vadd.f32 %v1266_v29, %v807_v8 }
 0x1ba   :  { %v811_v31 = vmax.f32 %v808_v30, 0.0 }
 0x1bc   :  { %v812_v32 = vpack.c.bf16 %v811_v31, %v811_v31 }
 0x1be   :  { %1159 = vmatmul.msk.bf16.vlgmr.msra.gmra.mxu0 %vm849_vm2, %v812_v32 }
 0x1bf   :  { %v809_v61 = vpop.f32.mrf.mxu3 }
 0x23b   :  { %v862_v28 = vpop.f32.mrf.mxu0 }
 0x23c   :  { %v863_v14 = vadd.f32 %v1267_v12, %v862_v28 }
 0x23e   :  { %866 = vst [vmem:[#allocation8] sm:$0xff] %v863_v14 }
 0x23f   :  { %877 = dma.vmem_to_hbm [thread:$0]  %s873_s14, 128, %s875_s16, [#allocation5]  }
 0x243   :  { %v864_v33 = vpop.f32.mrf.mxu0 }
 0x244   :  { %1332 = dma.done.wait [#allocation5], 128  }
 0x245   :  { %1333 = vsyncadd [#allocation5], 4294967168 }
 0x246   :  { %882 = vsyncpa [#allocation4], 1 }
 0x247   :  { %883 = vsyncpa [#allocation5], 1 }
 0x248   :  { %884 = vsyncpa [#allocation6], 1 }

</bundles_post_ra>
